<compile_context>
chip_gen: v5e
topology: v5e:2x2
jax: 0.10.0
libtpu: 0.0.40
codegen_flags: <defaults>
</compile_context>

<pallas_src>
from functools import partial

import jax
import jax.numpy as jnp
from jax.experimental import pallas as pl
from jax.experimental.pallas import tpu as pltpu

# Make the pure-JAX reference (and wrapper precompute) use full f32 matmul
# precision so the correctness comparison is not polluted by bf16 passes.
jax.config.update("jax_default_matmul_precision", "highest")


def _round_up(n, m):
    return ((n + m - 1) // m) * m


def _lr_pinn_kernel(x_ref, t_ref, sw_ref, sb_ref, w0_ref, w1_ref, w2_ref,
                    ew_ref, eb_ref, out_ref):
    """Batch-on-lanes forward for one (TILE_N)-wide batch tile."""
    f32 = jnp.float32

    x_row = x_ref[...]                                       # (1, TILE_N)
    t_row = t_ref[...]                                       # (1, TILE_N)

    # start layer (in-features = 2): VPU broadcast FMA, no MXU pass.
    h = jnp.tanh(sw_ref[:, 0:1] * x_row + sw_ref[:, 1:2] * t_row + sb_ref[...])

    # three hidden layers, weights precomputed (and transposed) in the wrapper:
    #   h <- tanh(W_k^T @ h)   with h laid out as (H, TILE_N).
    h = jnp.tanh(jnp.dot(w0_ref[...], h, preferred_element_type=f32))
    h = jnp.tanh(jnp.dot(w1_ref[...], h, preferred_element_type=f32))
    h = jnp.tanh(jnp.dot(w2_ref[...], h, preferred_element_type=f32))

    # end layer (out-features = 1): VPU multiply + sublane (XLU) reduction,
    # producing a lane-dense (1, TILE_N) store.
    out_ref[...] = jnp.sum(ew_ref[...] * h, axis=0, keepdims=True) + eb_ref[...]


def _choose_tile(n, max_tile_n):
    """Lane-aligned tile; prefer >= 2 grid blocks (v7x megacore) when possible."""
    max_tile_n = max(128, _round_up(int(max_tile_n), 128))   # guard caller value
    n128 = _round_up(n, 128)
    if n128 >= 1024:
        # Split into at least two blocks so the "parallel" batch axis can feed
        # both TensorCores on v7x; per-step overhead (~0.35 us) is negligible
        # at these tile sizes.
        half = _round_up(-(-n128 // 2), 128)
        return min(max_tile_n, half)
    return min(max_tile_n, n128)


@partial(jax.jit, static_argnames=("max_tile_n",))
def lr_pinn_phase2_forward(x, t, params, *, max_tile_n=8192):
    """x, t: (N, 1) float32.  params: torch-layout parameter dict."""
    x = x.astype(jnp.float32)
    t = t.astype(jnp.float32)
    N = x.shape[0]
    H = params["start_w"].shape[0]

    # --- wrapper glue: precompute low-rank weights, flip layout -------------
    # (tiny 32x8 @ 8x32 dots; fused under jit, negligible vs. the kernel)
    def w_t(col, alpha, row):
        # torch: W = col @ diag(alpha) @ row ; we need W^T for batch-on-lanes.
        return jnp.dot(col * alpha[None, :], row).T          # (H, H)

    sw = params["start_w"]                                   # (H, 2)
    sb = params["start_b"].reshape(H, 1)                     # (H, 1)
    w0t = w_t(params["col_0"], params["alpha_0"], params["row_0"])
    w1t = w_t(params["col_1"], params["alpha_1"], params["row_1"])
    w2t = w_t(params["col_2"], params["alpha_2"], params["row_2"])
    ew = params["end_w"].reshape(H, 1)                       # (H, 1)
    eb = params["end_b"].reshape(1, 1)                       # (1, 1)

    # batch on the lane axis, padded so every tile is lane-dense (x128).
    tile_n = _choose_tile(N, max_tile_n)
    n_pad = _round_up(N, tile_n)
    x_row = x.T                                              # (1, N)
    t_row = t.T                                              # (1, N)
    if n_pad != N:
        x_row = jnp.pad(x_row, ((0, 0), (0, n_pad - N)))
        t_row = jnp.pad(t_row, ((0, 0), (0, n_pad - N)))

    grid = (n_pad // tile_n,)
    const = lambda i: (0, 0)                                 # resident weights
    inp_map = lambda i: (0, i)                               # pipelined tiles

    out = pl.pallas_call(
        _lr_pinn_kernel,
        out_shape=jax.ShapeDtypeStruct((1, n_pad), jnp.float32),
        grid=grid,
        in_specs=[
            pl.BlockSpec((1, tile_n), inp_map),              # x row
            pl.BlockSpec((1, tile_n), inp_map),              # t row
            pl.BlockSpec((H, 2), const),                     # start weight
            pl.BlockSpec((H, 1), const),                     # start bias
            pl.BlockSpec((H, H), const),                     # W0^T
            pl.BlockSpec((H, H), const),                     # W1^T
            pl.BlockSpec((H, H), const),                     # W2^T
            pl.BlockSpec((H, 1), const),                     # end weight
            pl.BlockSpec((1, 1), const),                     # end bias
        ],
        out_specs=pl.BlockSpec((1, tile_n), inp_map),
        compiler_params=pltpu.CompilerParams(
            dimension_semantics=("parallel",)),              # shard tiles on v7x
    )(x_row, t_row, sw, sb, w0t, w1t, w2t, ew, eb)

    return out[:, :N].T                                      # (N, 1)


def make_params(key, hidden_dim, rank):
    """Parameters in the original torch layout."""
    ks = jax.random.split(key, 13)
    return {
        "start_w": jax.random.normal(ks[0], (hidden_dim, 2), jnp.float32) * 0.5,
        "start_b": jax.random.normal(ks[1], (hidden_dim,), jnp.float32) * 0.1,
        "end_w":   jax.random.normal(ks[2], (1, hidden_dim), jnp.float32) * 0.5,
        "end_b":   jax.random.normal(ks[3], (1,), jnp.float32) * 0.1,
        "col_0":   jax.random.normal(ks[4], (hidden_dim, rank), jnp.float32) * 0.2,
        "row_0":   jax.random.normal(ks[5], (rank, hidden_dim), jnp.float32) * 0.2,
        "alpha_0": jax.random.normal(ks[6], (rank,), jnp.float32),
        "col_1":   jax.random.normal(ks[7], (hidden_dim, rank), jnp.float32) * 0.2,
        "row_1":   jax.random.normal(ks[8], (rank, hidden_dim), jnp.float32) * 0.2,
        "alpha_1": jax.random.normal(ks[9], (rank,), jnp.float32),
        "col_2":   jax.random.normal(ks[10], (hidden_dim, rank), jnp.float32) * 0.2,
        "row_2":   jax.random.normal(ks[11], (rank, hidden_dim), jnp.float32) * 0.2,
        "alpha_2": jax.random.normal(ks[12], (rank,), jnp.float32),
    }


def reference_forward(x, t, p):
    """Pure-JAX reference mirroring the PyTorch module exactly."""
    def w(col, alpha, row):
        return (col * alpha[None, :]) @ row                  # col @ diag(a) @ row
    inputs = jnp.concatenate([x, t], axis=1)                 # (N, 2)
    h = jnp.tanh(inputs @ p["start_w"].T + p["start_b"][None, :])
    h = jnp.tanh(h @ w(p["col_0"], p["alpha_0"], p["row_0"]))
    h = jnp.tanh(h @ w(p["col_1"], p["alpha_1"], p["row_1"]))
    h = jnp.tanh(h @ w(p["col_2"], p["alpha_2"], p["row_2"]))
    return h @ p["end_w"].T + p["end_b"][None, :]


if __name__ == "__main__":
    hidden_dim = 32
    rank = 8

    key = jax.random.PRNGKey(0)
    kx, kt, kp = jax.random.split(key, 3)
    params = make_params(kp, hidden_dim, rank)

    # small batch (single 128-wide tile, padded)
    batch = 8
    x = jax.random.uniform(kx, (batch, 1), jnp.float32)
    t = jax.random.uniform(kt, (batch, 1), jnp.float32)
    out = jax.block_until_ready(lr_pinn_phase2_forward(x, t, params))
    ref = reference_forward(x, t, params)
    assert out.shape == (batch, 1)
    assert jnp.allclose(out, ref, atol=1e-4, rtol=1e-4)

    # medium, non-multiple-of-tile batch (exercises 2-block grid + padding)
    batch2 = 1500
    kx2, kt2 = jax.random.split(jax.random.fold_in(key, 7))
    x2 = jax.random.uniform(kx2, (batch2, 1), jnp.float32)
    t2 = jax.random.uniform(kt2, (batch2, 1), jnp.float32)
    out2 = jax.block_until_ready(lr_pinn_phase2_forward(x2, t2, params))
    ref2 = reference_forward(x2, t2, params)
    assert out2.shape == (batch2, 1)
    assert jnp.allclose(out2, ref2, atol=1e-4, rtol=1e-4)

    # larger batch (hits the 8192-lane tile cap, multi-step grid)
    batch3 = 20000
    kx3, kt3 = jax.random.split(jax.random.fold_in(key, 11))
    x3 = jax.random.uniform(kx3, (batch3, 1), jnp.float32)
    t3 = jax.random.uniform(kt3, (batch3, 1), jnp.float32)
    out3 = jax.block_until_ready(lr_pinn_phase2_forward(x3, t3, params))
    ref3 = reference_forward(x3, t3, params)
    assert out3.shape == (batch3, 1)
    assert jnp.allclose(out3, ref3, atol=1e-4, rtol=1e-4)

    print("KERNEL_OK")
</pallas_src>

<mosaic_0001>
module attributes {stable_mosaic.version = 11 : i64} {
  func.func @_lr_pinn_kernel(%arg0: i32, %arg1: memref<1x128xf32, #tpu.memory_space<vmem>>, %arg2: memref<1x128xf32, #tpu.memory_space<vmem>>, %arg3: memref<32x2xf32, #tpu.memory_space<vmem>>, %arg4: memref<32x1xf32, #tpu.memory_space<vmem>>, %arg5: memref<32x32xf32, #tpu.memory_space<vmem>>, %arg6: memref<32x32xf32, #tpu.memory_space<vmem>>, %arg7: memref<32x32xf32, #tpu.memory_space<vmem>>, %arg8: memref<32x1xf32, #tpu.memory_space<vmem>>, %arg9: memref<1x1xf32, #tpu.memory_space<vmem>>, %arg10: memref<1x128xf32, #tpu.memory_space<vmem>>) attributes {dimension_semantics = [#tpu.dimension_semantics<parallel>], iteration_bounds = array<i64: 1>, scalar_prefetch = 0 : i64, scratch_operands = 0 : i64, tpu.core_type = #tpu.core_type<tc>, window_params = [{transform_indices = @transform_0, window_bounds = array<i64: 1, 128>}, {transform_indices = @transform_1, window_bounds = array<i64: 1, 128>}, {pipeline_mode = #tpu.pipeline_mode<synchronous>, transform_indices = @transform_2, window_bounds = array<i64: 32, 2>}, {pipeline_mode = #tpu.pipeline_mode<synchronous>, transform_indices = @transform_3, window_bounds = array<i64: 32, 1>}, {pipeline_mode = #tpu.pipeline_mode<synchronous>, transform_indices = @transform_4, window_bounds = array<i64: 32, 32>}, {pipeline_mode = #tpu.pipeline_mode<synchronous>, transform_indices = @transform_5, window_bounds = array<i64: 32, 32>}, {pipeline_mode = #tpu.pipeline_mode<synchronous>, transform_indices = @transform_6, window_bounds = array<i64: 32, 32>}, {pipeline_mode = #tpu.pipeline_mode<synchronous>, transform_indices = @transform_7, window_bounds = array<i64: 32, 1>}, {pipeline_mode = #tpu.pipeline_mode<synchronous>, transform_indices = @transform_8, window_bounds = array<i64: 1, 1>}, {transform_indices = @transform_9, window_bounds = array<i64: 1, 128>}]} {
    %c0 = arith.constant 0 : index
    %c0_0 = arith.constant 0 : index
    %0 = vector.load %arg1[%c0, %c0_0] : memref<1x128xf32, #tpu.memory_space<vmem>>, vector<1x128xf32>
    %c0_1 = arith.constant 0 : index
    %c0_2 = arith.constant 0 : index
    %1 = vector.load %arg2[%c0_1, %c0_2] : memref<1x128xf32, #tpu.memory_space<vmem>>, vector<1x128xf32>
    %c0_3 = arith.constant 0 : index
    %c0_4 = arith.constant 0 : index
    %2 = vector.load %arg3[%c0_3, %c0_4] : memref<32x2xf32, #tpu.memory_space<vmem>>, vector<32x1xf32>
    %3 = vector.broadcast %2 : vector<32x1xf32> to vector<32x128xf32>
    %4 = vector.broadcast %0 : vector<1x128xf32> to vector<32x128xf32>
    %5 = arith.mulf %3, %4 : vector<32x128xf32>
    %c0_5 = arith.constant 0 : index
    %c1 = arith.constant 1 : index
    %6 = vector.load %arg3[%c0_5, %c1] : memref<32x2xf32, #tpu.memory_space<vmem>>, vector<32x1xf32>
    %7 = vector.broadcast %6 : vector<32x1xf32> to vector<32x128xf32>
    %8 = vector.broadcast %1 : vector<1x128xf32> to vector<32x128xf32>
    %9 = arith.mulf %7, %8 : vector<32x128xf32>
    %10 = arith.addf %5, %9 : vector<32x128xf32>
    %c0_6 = arith.constant 0 : index
    %c0_7 = arith.constant 0 : index
    %11 = vector.load %arg4[%c0_6, %c0_7] : memref<32x1xf32, #tpu.memory_space<vmem>>, vector<32x1xf32>
    %12 = vector.broadcast %11 : vector<32x1xf32> to vector<32x128xf32>
    %13 = arith.addf %10, %12 : vector<32x128xf32>
    %14 = math.tanh %13 : vector<32x128xf32>
    %c0_8 = arith.constant 0 : index
    %c0_9 = arith.constant 0 : index
    %15 = vector.load %arg5[%c0_8, %c0_9] : memref<32x32xf32, #tpu.memory_space<vmem>>, vector<32x32xf32>
    %cst = arith.constant dense<0.000000e+00> : vector<32x128xf32>
    %16 = tpu.matmul %15, %14, %cst {dimension_numbers = #tpu.dot_dimension_numbers<[1], [0], [0], [1], [0, 0, 1, 1], [], []>, precision = #tpu.contract_precision<fp32>} : vector<32x32xf32>, vector<32x128xf32>, vector<32x128xf32> -> vector<32x128xf32>
    %17 = math.tanh %16 : vector<32x128xf32>
    %c0_10 = arith.constant 0 : index
    %c0_11 = arith.constant 0 : index
    %18 = vector.load %arg6[%c0_10, %c0_11] : memref<32x32xf32, #tpu.memory_space<vmem>>, vector<32x32xf32>
    %cst_12 = arith.constant dense<0.000000e+00> : vector<32x128xf32>
    %19 = tpu.matmul %18, %17, %cst_12 {dimension_numbers = #tpu.dot_dimension_numbers<[1], [0], [0], [1], [0, 0, 1, 1], [], []>, precision = #tpu.contract_precision<fp32>} : vector<32x32xf32>, vector<32x128xf32>, vector<32x128xf32> -> vector<32x128xf32>
    %20 = math.tanh %19 : vector<32x128xf32>
    %c0_13 = arith.constant 0 : index
    %c0_14 = arith.constant 0 : index
    %21 = vector.load %arg7[%c0_13, %c0_14] : memref<32x32xf32, #tpu.memory_space<vmem>>, vector<32x32xf32>
    %cst_15 = arith.constant dense<0.000000e+00> : vector<32x128xf32>
    %22 = tpu.matmul %21, %20, %cst_15 {dimension_numbers = #tpu.dot_dimension_numbers<[1], [0], [0], [1], [0, 0, 1, 1], [], []>, precision = #tpu.contract_precision<fp32>} : vector<32x32xf32>, vector<32x128xf32>, vector<32x128xf32> -> vector<32x128xf32>
    %23 = math.tanh %22 : vector<32x128xf32>
    %c0_16 = arith.constant 0 : index
    %c0_17 = arith.constant 0 : index
    %24 = vector.load %arg8[%c0_16, %c0_17] : memref<32x1xf32, #tpu.memory_space<vmem>>, vector<32x1xf32>
    %25 = vector.broadcast %24 : vector<32x1xf32> to vector<32x128xf32>
    %26 = arith.mulf %25, %23 : vector<32x128xf32>
    %cst_18 = arith.constant dense<0.000000e+00> : vector<128xf32>
    %27 = vector.multi_reduction <add>, %26, %cst_18 [0] : vector<32x128xf32> to vector<128xf32>
    %28 = vector.shape_cast %27 : vector<128xf32> to vector<1x128xf32>
    %c0_19 = arith.constant 0 : index
    %c0_20 = arith.constant 0 : index
    %29 = vector.load %arg9[%c0_19, %c0_20] : memref<1x1xf32, #tpu.memory_space<vmem>>, vector<1x1xf32>
    %30 = vector.broadcast %29 : vector<1x1xf32> to vector<1x128xf32>
    %31 = arith.addf %28, %30 : vector<1x128xf32>
    %c0_21 = arith.constant 0 : index
    %c0_22 = arith.constant 0 : index
    %32 = vector.load %arg10[%c0_21, %c0_22] : memref<1x128xf32, #tpu.memory_space<vmem>>, vector<1x128xf32>
    tpu.vector_store %arg10[%c0_21, %c0_22], %31 {strides = array<i32>} : memref<1x128xf32, #tpu.memory_space<vmem>>, vector<1x128xf32>,
    return
  }
  func.func @transform_0(%arg0: i32) -> (i32, i32) {
    %c0_i32 = arith.constant 0 : i32
    %c0_i32_0 = arith.constant 0 : i32
    return %c0_i32, %arg0 : i32, i32
  }
  func.func @transform_1(%arg0: i32) -> (i32, i32) {
    %c0_i32 = arith.constant 0 : i32
    %c0_i32_0 = arith.constant 0 : i32
    return %c0_i32, %arg0 : i32, i32
  }
  func.func @transform_2(%arg0: i32) -> (i32, i32) {
    %c0_i32 = arith.constant 0 : i32
    %c0_i32_0 = arith.constant 0 : i32
    %c0_i32_1 = arith.constant 0 : i32
    return %c0_i32, %c0_i32_0 : i32, i32
  }
  func.func @transform_3(%arg0: i32) -> (i32, i32) {
    %c0_i32 = arith.constant 0 : i32
    %c0_i32_0 = arith.constant 0 : i32
    %c0_i32_1 = arith.constant 0 : i32
    return %c0_i32, %c0_i32_0 : i32, i32
  }
  func.func @transform_4(%arg0: i32) -> (i32, i32) {
    %c0_i32 = arith.constant 0 : i32
    %c0_i32_0 = arith.constant 0 : i32
    %c0_i32_1 = arith.constant 0 : i32
    return %c0_i32, %c0_i32_0 : i32, i32
  }
  func.func @transform_5(%arg0: i32) -> (i32, i32) {
    %c0_i32 = arith.constant 0 : i32
    %c0_i32_0 = arith.constant 0 : i32
    %c0_i32_1 = arith.constant 0 : i32
    return %c0_i32, %c0_i32_0 : i32, i32
  }
  func.func @transform_6(%arg0: i32) -> (i32, i32) {
    %c0_i32 = arith.constant 0 : i32
    %c0_i32_0 = arith.constant 0 : i32
    %c0_i32_1 = arith.constant 0 : i32
    return %c0_i32, %c0_i32_0 : i32, i32
  }
  func.func @transform_7(%arg0: i32) -> (i32, i32) {
    %c0_i32 = arith.constant 0 : i32
    %c0_i32_0 = arith.constant 0 : i32
    %c0_i32_1 = arith.constant 0 : i32
    return %c0_i32, %c0_i32_0 : i32, i32
  }
  func.func @transform_8(%arg0: i32) -> (i32, i32) {
    %c0_i32 = arith.constant 0 : i32
    %c0_i32_0 = arith.constant 0 : i32
    %c0_i32_1 = arith.constant 0 : i32
    return %c0_i32, %c0_i32_0 : i32, i32
  }
  func.func @transform_9(%arg0: i32) -> (i32, i32) {
    %c0_i32 = arith.constant 0 : i32
    %c0_i32_0 = arith.constant 0 : i32
    return %c0_i32, %arg0 : i32, i32
  }
}

</mosaic_0001>

<bundles_post_ra>
// kernel: lr_pinn_phase2_forward.1
= control target key start
LH: loop header
LB: loop body
LE: loop exit
PB: predicated region body
PF: predicated region fallthrough
CT: control target
= control target key end

     0   :  { %v1124_v0 = vmov 0   ;;  %v1125_v5 = vmov 1   ;;  %vm130_vm0 = vcmask 261120   ;;  %s1399_s2 = inlined_call_operand.vmem [shape: f32[32,2], index: 2, kind: input, shape index: {}]   ;;  %s1400_s8 = inlined_call_operand.<no memory space> [shape: f32[1,1], index: 8, kind: input, shape index: {}]   ;;  %s1401_s0 = inlined_call_operand.vmem [shape: f32[1,128], index: 0, kind: input, shape index: {}]   ;;  %s1402_s1 = inlined_call_operand.vmem [shape: f32[1,128], index: 1, kind: input, shape index: {}]   ;;  %s1403_s3 = inlined_call_operand.vmem [shape: f32[32,1], index: 3, kind: input, shape index: {}]   ;;  %s1404_s7 = inlined_call_operand.vmem [shape: f32[32,1], index: 7, kind: input, shape index: {}]   ;;  %s1405_s4 = inlined_call_operand.vmem [shape: f32[32,32], index: 4, kind: input, shape index: {}]   ;;  %s1406_s5 = inlined_call_operand.vmem [shape: f32[32,32], index: 5, kind: input, shape index: {}]   ;;  %s1407_s6 = inlined_call_operand.vmem [shape: f32[32,32], index: 6, kind: input, shape index: {}]   ;;  %s1408_s9 = inlined_call_operand.vmem [shape: f32[1,128], index: 9, kind: output, shape index: {}]  }
   0x1   :  { %1085 = vset.pattern.permute.xlu2 %v1124_v0  ;;  %1083 = vset.pattern.permute.xlu1 %v1124_v0  ;;  %v39_v1 = vld [vmem:[%s1399_s2 + $0x18] sm:$0xff]  ;;  %v38_v2 = vld [vmem:[%s1399_s2 + $0x10] sm:$0xff]  ;;  %v37_v3 = vld [vmem:[%s1399_s2 + $0x8] sm:$0xff]  ;;  %v14_v4 = vstv %s1400_s8 }
   0x2   :  { %1081 = vset.pattern.permute.xlu0 %v1124_v0  ;;  %52 = vperm.xlu1 %1083, %v38_v2   ;;  %15 = vst [vmem:[#allocation2] sm:$0x1] %v14_v4  ;;  %v36_v6 = vld [vmem:[%s1399_s2] sm:$0xff]  ;;  %v97_v7 = vld [vmem:[%s1403_s3 + $0x18] sm:$0xff]  ;;  %v96_v8 = vld [vmem:[%s1403_s3 + $0x10] sm:$0xff] }
   0x3   :  { %57 = vperm.xlu0 %1081, %v39_v1   ;;  %47 = vperm.xlu2 %1085, %v37_v3   ;;  %v94_v9 = vld [vmem:[%s1403_s3] sm:$0xff]  ;;  %v95_v10 = vld [vmem:[%s1403_s3 + $0x8] sm:$0xff]  ;;  %v1023_v14 = vld [vmem:[%s1404_s7 + $0x10] sm:$0xff] }
   0x4   :  { %v1021_v11 = vld [vmem:[%s1404_s7] sm:$0xff]  ;;  %v1022_v13 = vld [vmem:[%s1404_s7 + $0x8] sm:$0xff]  ;;  %v1024_v15 = vld [vmem:[%s1404_s7 + $0x18] sm:$0xff] }
   0x5   :  { %v1090_v21 = vld [vmem:[%s1401_s0] ss:$0 sm:$0xff]  ;;  %v128_v34 = vld [vmem:[%s1405_s4 + $0x10] sm:$0xff]  ;;  %v129_v48 = vld [vmem:[%s1405_s4 + $0x18] sm:$0xff] }
   0x6   :  { %v1091_v22 = vld [vmem:[%s1402_s1] ss:$0 sm:$0xff]  ;;  %v138_v39 = vsel %vm130_vm0, %v128_v34, 0  ;;  %v141_v57 = vsel %vm130_vm0, %v129_v48, 0  ;;  %v127_v59 = vld [vmem:[%s1405_s4 + $0x8] sm:$0xff] }
   0x7   :  { %v126_v36 = vld [vmem:[%s1405_s4] sm:$0xff]  ;;  %v1229_v44 = vand.u32 4294901760, %v138_v39  ;;  %v1254_v63 = vand.u32 4294901760, %v141_v57 }
   0x8   :  { %v132_v42 = vsel %vm130_vm0, %v126_v36, 0 }
   0x9   :  { %v1058_v12 = vld [vmem:[#allocation2] sm:$0x1]  ;;  %v1231_v45 = vand.u32 4294901760, %v132_v42  ;;  %v1237_v55 = vsub.f32 %v138_v39, %v1229_v44 }
   0xa   :  { %1084 = vset.pattern.permute.xlu1 %v1125_v5 }
   0xb   :  { %1082 = vset.pattern.permute.xlu0 %v1125_v5  ;;  %1086 = vset.pattern.permute.xlu2 %v1125_v5  ;;  %v1243_v58 = vsub.f32 %v132_v42, %v1231_v45  ;;  %v181_v62 = vand.u32 4294901760, %v1237_v55 }
   0xc   :  { %80 = vperm.xlu0 %1082, %v39_v1   ;;  %76 = vperm.xlu1 %1084, %v38_v2  }
   0xd   :  { %72 = vperm.xlu2 %1086, %v37_v3   ;;  %v165_v2 = vand.u32 4294901760, %v1243_v58 }
  0x14   :  { %1087 = vset.pattern.permute.xlu1 %v1124_v0  ;;  %68 = vperm.xlu0 %1082, %v36_v6  }
  0x15   :  { %1088 = vset.pattern.permute.xlu2 %v1124_v0  ;;  %115 = vperm.xlu1 %1087, %v97_v7   ;;  %v182_v7 = vsub.f32 %v1237_v55, %v181_v62 }
  0x16   :  { %42 = vperm.xlu2 %1088, %v36_v6  }
  0x1c   :  { %1089 = vset.pattern.permute.xlu0 %v1124_v0  ;;  %v135_v0 = vsel %vm130_vm0, %v127_v59, 0 }
  0x1d   :  { %110 = vperm.xlu1 %1087, %v96_v8   ;;  %100 = vperm.xlu0 %1089, %v94_v9   ;;  %v1259_v5 = vand.u32 4294901760, %v135_v0  ;;  %v1265_v8 = vsub.f32 %v141_v57, %v1254_v63 }
  0x1e   :  { %105 = vperm.xlu2 %1088, %v95_v10  }
  0x25   :  { %1027 = vperm.xlu1 %1087, %v1021_v11   ;;  %1061 = vperm.xlu0 %1089, %v1058_v12   ;;  %v166_v12 = vsub.f32 %v1243_v58, %v165_v2 }
  0x26   :  { %1032 = vperm.xlu2 %1088, %v1022_v13  }
  0x2d   :  { %1037 = vperm.xlu1 %1087, %v1023_v14  }
  0x2e   :  { %1042 = vperm.xlu2 %1088, %v1024_v15  }
  0x5d   :  { %v48_v16 = vpop.permute.xlu2 %47 }
  0x5e   :  { %v64_v23 = vmul.f32 %v1090_v21, %v48_v16  ;;  %v172_v16 = vsub.f32 %v135_v0, %v1259_v5 }
  0x67   :  { %v73_v17 = vpop.permute.xlu2 %72 }
  0x68   :  { %v87_v24 = vmul.f32 %v1091_v22, %v73_v17  ;;  %v183_v17 = vand.u32 4294901760, %v182_v7 }
  0x6a   :  { %v91_v27 = vadd.f32 %v87_v24, %v64_v23 }
  0x70   :  { %v43_v20 = vpop.permute.xlu2 %42 }
  0x71   :  { %v63_v38 = vmul.f32 %v1090_v21, %v43_v20 }
  0x74   :  { %v53_v18 = vpop.permute.xlu1 %52 }
  0x75   :  { %v58_v19 = vpop.permute.xlu0 %57  ;;  %v65_v43 = vmul.f32 %v1090_v21, %v53_v18 }
  0x76   :  { %v66_v30 = vmul.f32 %v1090_v21, %v58_v19  ;;  %v189_v19 = vand.u32 4294901760, %v1265_v8  ;;  %v167_v21 = vand.u32 4294901760, %v166_v12 }
  0x78   :  { %v106_v28 = vpop.permute.xlu2 %105 }
  0x79   :  { %v119_v31 = vadd.f32 %v106_v28, %v91_v27 }
  0x7b   :  { %1092 = vtanh.f32 %v119_v31 }
  0x7e   :  { %v81_v25 = vpop.permute.xlu0 %80  ;;  %v77_v26 = vpop.permute.xlu1 %76 }
  0x7f   :  { %v89_v29 = vmul.f32 %v1091_v22, %v81_v25  ;;  %v88_v40 = vmul.f32 %v1091_v22, %v77_v26  ;;  %v173_v25 = vand.u32 4294901760, %v172_v16  ;;  %v190_v26 = vsub.f32 %v1265_v8, %v189_v19 }
  0x81   :  { %v93_v33 = vadd.f32 %v89_v29, %v66_v30  ;;  %v92_v46 = vadd.f32 %v88_v40, %v65_v43  ;;  %v1093_v49 = vpop.eup %1092  ;;  %v174_v30 = vsub.f32 %v172_v16, %v173_v25  ;;  %v191_v31 = vand.u32 4294901760, %v190_v26 }
  0x82   :  { %v1248_v60 = vand.u32 4294901760, %v1093_v49 }
  0x84   :  { %v221_v4 = vsub.f32 %v1093_v49, %v1248_v60 }
  0x86   :  { %v69_v32 = vpop.permute.xlu0 %68  ;;  %v222_v15 = vand.u32 4294901760, %v221_v4 }
  0x87   :  { %v116_v35 = vpop.permute.xlu1 %115  ;;  %v86_v41 = vmul.f32 %v1091_v22, %v69_v32 }
  0x88   :  { %v121_v37 = vadd.f32 %v116_v35, %v93_v33  ;;  %v223_v24 = vsub.f32 %v221_v4, %v222_v15  ;;  %v175_v33 = vand.u32 4294901760, %v174_v30  ;;  %v427_v30 = vld [vmem:[%s1406_s5 + $0x10] sm:$0xff] }
  0x89   :  { %v90_v47 = vadd.f32 %v86_v41, %v63_v38 }
  0x8a   :  { %1094 = vtanh.f32 %v121_v37  ;;  %v224_v29 = vand.u32 4294901760, %v223_v24 }
  0x8f   :  { %v111_v50 = vpop.permute.xlu1 %110  ;;  %v101_v51 = vpop.permute.xlu0 %100 }
  0x90   :  { %v1095_v52 = vpop.eup %1094  ;;  %v120_v53 = vadd.f32 %v111_v50, %v92_v46  ;;  %v118_v54 = vadd.f32 %v101_v51, %v90_v47 }
  0x91   :  { %v1239_v56 = vand.u32 4294901760, %v1095_v52 }
  0x92   :  { %1096 = vtanh.f32 %v120_v53 }
  0x93   :  { %1098 = vtanh.f32 %v118_v54  ;;  %156 = vmatpush.msra.mxu0 %v1239_v56  ;;  %1071 = vmatpush.msra.mxu2 %v1239_v56  ;;  %v209_v61 = vsub.f32 %v1095_v52, %v1239_v56 }
  0x95   :  { %v210_v1 = vand.u32 4294901760, %v209_v61 }
  0x97   :  { %v211_v3 = vsub.f32 %v209_v61, %v210_v1 }
  0x98   :  { %v1097_v6 = vpop.eup %1096 }
  0x99   :  { %v1099_v9 = vpop.eup %1098  ;;  %v157_v10 = vand.u32 4294901760, %v1097_v6  ;;  %v212_v11 = vand.u32 4294901760, %v211_v3 }
  0x9a   :  { %v161_v13 = vand.u32 4294901760, %v1099_v9 }
  0x9b   :  { %158 = vmatpush.msra.mxu0 %v157_v10  ;;  %1072 = vmatpush.msra.mxu2 %v157_v10  ;;  %v215_v14 = vsub.f32 %v1097_v6, %v157_v10  ;;  %v425_v6 = vld [vmem:[%s1406_s5] sm:$0xff] }
  0x9c   :  { %213 = vmatpush.msra.mxu1 %v212_v11  ;;  %1075 = vmatpush.msra.mxu3 %v212_v11  ;;  %v227_v18 = vsub.f32 %v1099_v9, %v161_v13  ;;  %v430_v11 = vsel %vm130_vm0, %v425_v6, 0 }
  0x9d   :  { %160 = vmatpush.msra.mxu0 %v1248_v60  ;;  %1073 = vmatpush.msra.mxu2 %v1248_v60  ;;  %v216_v20 = vand.u32 4294901760, %v215_v14 }
  0x9e   :  { %v228_v22 = vand.u32 4294901760, %v227_v18 }
  0x9f   :  { %162 = vmatpush.msra.mxu0 %v161_v13  ;;  %1074 = vmatpush.msra.mxu2 %v161_v13  ;;  %v217_v23 = vsub.f32 %v215_v14, %v216_v20 }
  0xa0   :  { %184 = vmatmul.f32.vlgmr.msra.gmra.mxu2 %v183_v17  ;;  %v229_v28 = vsub.f32 %v227_v18, %v228_v22  ;;  %168 = vmatmul.f32.vlgmr.msra.gmra.mxu0 %v167_v21 }
  0xa1   :  { %354 = vmatpush.msrb.mxu0 %v210_v1  ;;  %263 = vmatpush.msrb.mxu2 %v209_v61  ;;  %v218_v27 = vand.u32 4294901760, %v217_v23 }
  0xa2   :  { %v230_v32 = vand.u32 4294901760, %v229_v28 }
  0xa3   :  { %358 = vmatpush.msrb.mxu0 %v216_v20  ;;  %266 = vmatpush.msrb.mxu2 %v215_v14 }
  0xa4   :  { %219 = vmatpush.msra.mxu1 %v218_v27  ;;  %1076 = vmatpush.msra.mxu3 %v218_v27 }
  0xa5   :  { %362 = vmatpush.msrb.mxu0 %v222_v15  ;;  %269 = vmatpush.msrb.mxu2 %v221_v4  ;;  %v1302_v15 = vand.u32 4294901760, %v430_v11 }
  0xa6   :  { %225 = vmatpush.msra.mxu1 %v224_v29  ;;  %1077 = vmatpush.msra.mxu3 %v224_v29 }
  0xa7   :  { %366 = vmatpush.msrb.mxu0 %v228_v22  ;;  %272 = vmatpush.msrb.mxu2 %v227_v18  ;;  %v426_v18 = vld [vmem:[%s1406_s5 + $0x8] sm:$0xff]  ;;  %v462_v20 = vsub.f32 %v430_v11, %v1302_v15 }
  0xa8   :  { %231 = vmatpush.msra.mxu1 %v230_v32  ;;  %1078 = vmatpush.msra.mxu3 %v230_v32  ;;  %v433_v22 = vsel %vm130_vm0, %v426_v18, 0 }
  0xa9   :  { %192 = vmatmul.f32.gmra.mxu2 %v191_v31  ;;  %241 = vmatmul.f32.vlgmr.msra.gmra.mxu3 %v1229_v44  ;;  %v1313_v26 = vand.u32 4294901760, %v433_v22 }
  0xaa   :  { %397 = vmatpush.msrb.mxu1 %v1239_v56  ;;  %307 = vmatpush.msrb.mxu3 %v1239_v56 }
  0xab   :  { %233 = vmatmul.f32.vlgmr.msra.gmra.mxu1 %v1231_v45  ;;  %176 = vmatmul.f32.gmra.mxu0 %v175_v33 }
  0xac   :  { %399 = vmatpush.msrb.mxu1 %v157_v10  ;;  %309 = vmatpush.msrb.mxu3 %v157_v10 }
  0xae   :  { %401 = vmatpush.msrb.mxu1 %v1248_v60  ;;  %311 = vmatpush.msrb.mxu3 %v1248_v60 }
  0xb0   :  { %403 = vmatpush.msrb.mxu1 %v161_v13  ;;  %313 = vmatpush.msrb.mxu3 %v161_v13 }
  0xb1   :  { %275 = vmatmul.f32.vlgmr.msrb.gmra.mxu2 %v1243_v58  ;;  %245 = vmatmul.f32.gmra.mxu3 %v1254_v63 }
  0xb3   :  { %237 = vmatmul.f32.gmra.mxu1 %v1259_v5  ;;  %368 = vmatmul.f32.vlgmr.msrb.gmra.mxu0 %v1231_v45 }
  0xb9   :  { %280 = vmatmul.f32.gmra.mxu2 %v172_v16  ;;  %317 = vmatmul.f32.vlgmr.msrb.gmra.mxu3 %v165_v2 }
  0xbb   :  { %405 = vmatmul.f32.vlgmr.msrb.gmra.mxu1 %v1231_v45  ;;  %372 = vmatmul.f32.gmra.mxu0 %v1259_v5 }
  0xc1   :  { %285 = vmatmul.f32.gmra.mxu2 %v1237_v55  ;;  %323 = vmatmul.f32.gmra.mxu3 %v173_v25  ;;  %v463_v25 = vand.u32 4294901760, %v462_v20 }
  0xc3   :  { %409 = vmatmul.f32.gmra.mxu1 %v1259_v5  ;;  %376 = vmatmul.f32.gmra.mxu0 %v1229_v44  ;;  %v464_v33 = vsub.f32 %v462_v20, %v463_v25 }
  0xc9   :  { %290 = vmatmul.f32.gmra.mxu2 %v1265_v8  ;;  %329 = vmatmul.f32.gmra.mxu3 %v181_v62 }
  0xcb   :  { %413 = vmatmul.f32.gmra.mxu1 %v1229_v44  ;;  %380 = vmatmul.f32.gmra.mxu0 %v1254_v63 }
  0xd1   :  { %335 = vmatmul.f32.gmra.mxu3 %v189_v19 }
  0xd3   :  { %417 = vmatmul.f32.gmra.mxu1 %v1254_v63 }
 0x11d   :  { %v169_v34 = vpop.f32.mrf.mxu0 }
 0x123   :  { %v185_v35 = vpop.f32.mrf.mxu2 }
 0x128   :  { %v234_v36 = vpop.f32.mrf.mxu1  ;;  %v177_v39 = vpop.f32.mrf.mxu0 }
 0x129   :  { %v235_v52 = vadd.f32 %v234_v36, %v169_v34  ;;  %v470_v34 = vsub.f32 %v433_v22, %v1313_v26 }
 0x12c   :  { %v193_v37 = vpop.f32.mrf.mxu2  ;;  %v242_v38 = vpop.f32.mrf.mxu3 }
 0x12d   :  { %v243_v54 = vadd.f32 %v242_v38, %v185_v35  ;;  %v436_v38 = vsel %vm130_vm0, %v427_v30, 0 }
 0x130   :  { %v238_v40 = vpop.f32.mrf.mxu1  ;;  %v369_v43 = vpop.f32.mrf.mxu0 }
 0x131   :  { %v239_v50 = vadd.f32 %v238_v40, %v177_v39 }
 0x134   :  { %v276_v41 = vpop.f32.mrf.mxu2  ;;  %v246_v42 = vpop.f32.mrf.mxu3 }
 0x135   :  { %v277_v55 = vadd.f32 %v276_v41, %v235_v52  ;;  %v247_v3 = vadd.f32 %v246_v42, %v193_v37  ;;  %v465_v41 = vand.u32 4294901760, %v464_v33  ;;  %v471_v42 = vand.u32 4294901760, %v470_v34 }
 0x138   :  { %v406_v45 = vpop.f32.mrf.mxu1  ;;  %v373_v48 = vpop.f32.mrf.mxu0 }
 0x13c   :  { %v281_v46 = vpop.f32.mrf.mxu2  ;;  %v318_v47 = vpop.f32.mrf.mxu3 }
 0x13d   :  { %v282_v53 = vadd.f32 %v281_v46, %v239_v50  ;;  %v319_v58 = vadd.f32 %v318_v47, %v277_v55  ;;  %v472_v50 = vsub.f32 %v470_v34, %v471_v42 }
 0x13f   :  { %v370_v0 = vadd.f32 %v369_v43, %v319_v58  ;;  %v1327_v43 = vand.u32 4294901760, %v436_v38 }
 0x140   :  { %v410_v44 = vpop.f32.mrf.mxu1  ;;  %v377_v57 = vpop.f32.mrf.mxu0 }
 0x141   :  { %v407_v7 = vadd.f32 %v406_v45, %v370_v0 }
 0x144   :  { %v324_v49 = vpop.f32.mrf.mxu3  ;;  %v286_v51 = vpop.f32.mrf.mxu2 }
 0x145   :  { %v325_v56 = vadd.f32 %v324_v49, %v282_v53  ;;  %v287_v59 = vadd.f32 %v286_v51, %v243_v54  ;;  %v478_v51 = vsub.f32 %v436_v38, %v1327_v43 }
 0x147   :  { %v374_v62 = vadd.f32 %v373_v48, %v325_v56  ;;  %v428_v48 = vld [vmem:[%s1406_s5 + $0x18] sm:$0xff]  ;;  %v473_v56 = vand.u32 4294901760, %v472_v50 }
 0x148   :  { %v414_v61 = vpop.f32.mrf.mxu1  ;;  %v381_v10 = vpop.f32.mrf.mxu0  ;;  %v439_v54 = vsel %vm130_vm0, %v428_v48, 0 }
 0x149   :  { %v411_v4 = vadd.f32 %v410_v44, %v374_v62  ;;  %v485_v58 = vand.u32 4294901760, %v439_v54 }
 0x14c   :  { %v330_v60 = vpop.f32.mrf.mxu3  ;;  %v291_v2 = vpop.f32.mrf.mxu2 }
 0x14d   :  { %v331_v63 = vadd.f32 %v330_v60, %v287_v59  ;;  %v292_v8 = vadd.f32 %v291_v2, %v247_v3 }
 0x14f   :  { %v378_v1 = vadd.f32 %v377_v57, %v331_v63  ;;  %v479_v57 = vand.u32 4294901760, %v478_v51 }
 0x150   :  { %v418_v13 = vpop.f32.mrf.mxu1 }
 0x151   :  { %v415_v5 = vadd.f32 %v414_v61, %v378_v1  ;;  %v480_v60 = vsub.f32 %v478_v51, %v479_v57  ;;  %v486_v61 = vsub.f32 %v439_v54, %v485_v58 }
 0x153   :  { %1100 = vtanh.f32 %v415_v5  ;;  %v481_v62 = vand.u32 4294901760, %v480_v60  ;;  %v487_v63 = vand.u32 4294901760, %v486_v61 }
 0x154   :  { %v336_v9 = vpop.f32.mrf.mxu3  ;;  %1102 = vtanh.f32 %v411_v4 }
 0x155   :  { %v337_v12 = vadd.f32 %v336_v9, %v292_v8  ;;  %1104 = vtanh.f32 %v407_v7  ;;  %v488_v0 = vsub.f32 %v486_v61, %v487_v63 }
 0x157   :  { %v382_v14 = vadd.f32 %v381_v10, %v337_v12  ;;  %v489_v1 = vand.u32 4294901760, %v488_v0 }
 0x159   :  { %v1101_v16 = vpop.eup %1100  ;;  %v419_v17 = vadd.f32 %v418_v13, %v382_v14 }
 0x15a   :  { %v1103_v19 = vpop.eup %1102  ;;  %v1308_v21 = vand.u32 4294901760, %v1101_v16 }
 0x15b   :  { %1106 = vtanh.f32 %v419_v17  ;;  %v1105_v23 = vpop.eup %1104  ;;  %v1311_v24 = vand.u32 4294901760, %v1103_v19 }
 0x15c   :  { %v513_v27 = vsub.f32 %v1101_v16, %v1308_v21  ;;  %v1316_v28 = vand.u32 4294901760, %v1105_v23 }
 0x15d   :  { %v519_v32 = vsub.f32 %v1103_v19, %v1311_v24 }
 0x15e   :  { %v525_v36 = vsub.f32 %v1105_v23, %v1316_v28  ;;  %v514_v37 = vand.u32 4294901760, %v513_v27 }
 0x15f   :  { %v520_v40 = vand.u32 4294901760, %v519_v32 }
 0x160   :  { %v515_v46 = vsub.f32 %v513_v27, %v514_v37  ;;  %v526_v47 = vand.u32 4294901760, %v525_v36 }
 0x161   :  { %v1107_v29 = vpop.eup %1106  ;;  %v521_v49 = vsub.f32 %v519_v32, %v520_v40 }
 0x162   :  { %v453_v31 = vand.u32 4294901760, %v1107_v29  ;;  %v516_v52 = vand.u32 4294901760, %v515_v46  ;;  %v527_v53 = vsub.f32 %v525_v36, %v526_v47 }
 0x163   :  { %v522_v55 = vand.u32 4294901760, %v521_v49 }
 0x164   :  { %454 = vmatpush.msra.mxu2 %v453_v31  ;;  %605 = vmatpush.msra.mxu1 %v453_v31  ;;  %v507_v35 = vsub.f32 %v1107_v29, %v453_v31  ;;  %v528_v59 = vand.u32 4294901760, %v527_v53 }
 0x166   :  { %456 = vmatpush.msra.mxu2 %v1308_v21  ;;  %561 = vmatpush.msra.mxu0 %v507_v35  ;;  %v508_v39 = vand.u32 4294901760, %v507_v35 }
 0x167   :  { %607 = vmatpush.msra.mxu1 %v1308_v21 }
 0x168   :  { %458 = vmatpush.msra.mxu2 %v1311_v24  ;;  %564 = vmatpush.msra.mxu0 %v513_v27  ;;  %v509_v45 = vsub.f32 %v507_v35, %v508_v39 }
 0x169   :  { %609 = vmatpush.msra.mxu1 %v1311_v24 }
 0x16a   :  { %460 = vmatpush.msra.mxu2 %v1316_v28  ;;  %567 = vmatpush.msra.mxu0 %v519_v32  ;;  %v510_v44 = vand.u32 4294901760, %v509_v45 }
 0x16b   :  { %611 = vmatpush.msra.mxu1 %v1316_v28  ;;  %466 = vmatmul.f32.vlgmr.msra.gmra.mxu2 %v465_v41  ;;  %v723_v41 = vld [vmem:[%s1407_s6] sm:$0xff] }
 0x16c   :  { %652 = vmatpush.msrb.mxu2 %v508_v39  ;;  %511 = vmatpush.msra.mxu3 %v510_v44  ;;  %v728_v45 = vsel %vm130_vm0, %v723_v41, 0 }
 0x16d   :  { %570 = vmatpush.msra.mxu0 %v525_v36  ;;  %615 = vmatmul.f32.vlgmr.msra.gmra.mxu1 %v463_v25  ;;  %v1354_v49 = vand.u32 4294901760, %v728_v45 }
 0x16e   :  { %656 = vmatpush.msrb.mxu2 %v514_v37  ;;  %517 = vmatpush.msra.mxu3 %v516_v52  ;;  %v724_v52 = vld [vmem:[%s1407_s6 + $0x8] sm:$0xff] }
 0x16f   :  { %573 = vmatmul.f32.vlgmr.msra.gmra.mxu0 %v462_v20  ;;  %v760_v54 = vsub.f32 %v728_v45, %v1354_v49 }
 0x170   :  { %660 = vmatpush.msrb.mxu2 %v520_v40  ;;  %523 = vmatpush.msra.mxu3 %v522_v55 }
 0x171   :  { %v761_v60 = vand.u32 4294901760, %v760_v54 }
 0x172   :  { %664 = vmatpush.msrb.mxu2 %v526_v47  ;;  %529 = vmatpush.msra.mxu3 %v528_v59 }
 0x173   :  { %474 = vmatmul.f32.gmra.mxu2 %v473_v56  ;;  %531 = vmatmul.f32.vlgmr.msra.gmra.mxu3 %v1302_v15  ;;  %v731_v56 = vsel %vm130_vm0, %v724_v52, 0 }
 0x174   :  { %695 = vmatpush.msrb.mxu3 %v453_v31 }
 0x175   :  { %621 = vmatmul.f32.gmra.mxu1 %v471_v42 }
 0x176   :  { %697 = vmatpush.msrb.mxu3 %v1308_v21 }
 0x177   :  { %578 = vmatmul.f32.gmra.mxu0 %v470_v34 }
 0x178   :  { %699 = vmatpush.msrb.mxu3 %v1311_v24 }
 0x17a   :  { %701 = vmatpush.msrb.mxu3 %v1316_v28 }
 0x17b   :  { %482 = vmatmul.f32.gmra.mxu2 %v481_v62  ;;  %535 = vmatmul.f32.gmra.mxu3 %v1313_v26 }
 0x17d   :  { %627 = vmatmul.f32.gmra.mxu1 %v479_v57 }
 0x17f   :  { %583 = vmatmul.f32.gmra.mxu0 %v478_v51 }
 0x183   :  { %490 = vmatmul.f32.gmra.mxu2 %v489_v1  ;;  %539 = vmatmul.f32.gmra.mxu3 %v1327_v43 }
 0x185   :  { %633 = vmatmul.f32.gmra.mxu1 %v487_v63  ;;  %v1369_v63 = vand.u32 4294901760, %v731_v56 }
 0x187   :  { %588 = vmatmul.f32.gmra.mxu0 %v486_v61 }
 0x18b   :  { %543 = vmatmul.f32.gmra.mxu3 %v485_v58  ;;  %666 = vmatmul.f32.vlgmr.msrb.gmra.mxu2 %v1302_v15 }
 0x193   :  { %670 = vmatmul.f32.gmra.mxu2 %v1313_v26  ;;  %703 = vmatmul.f32.vlgmr.msrb.gmra.mxu3 %v1302_v15 }
 0x19b   :  { %674 = vmatmul.f32.gmra.mxu2 %v1327_v43  ;;  %707 = vmatmul.f32.gmra.mxu3 %v1313_v26 }
 0x1a3   :  { %678 = vmatmul.f32.gmra.mxu2 %v485_v58  ;;  %711 = vmatmul.f32.gmra.mxu3 %v1327_v43 }
 0x1ab   :  { %715 = vmatmul.f32.gmra.mxu3 %v485_v58 }
 0x1ea   :  { %v616_v10 = vpop.f32.mrf.mxu1 }
 0x1ec   :  { %v574_v7 = vpop.f32.mrf.mxu0 }
 0x1ee   :  { %v467_v2 = vpop.f32.mrf.mxu2 }
 0x1f2   :  { %v622_v14 = vpop.f32.mrf.mxu1 }
 0x1f4   :  { %v579_v13 = vpop.f32.mrf.mxu0 }
 0x1f6   :  { %v475_v3 = vpop.f32.mrf.mxu2  ;;  %v532_v4 = vpop.f32.mrf.mxu3 }
 0x1f7   :  { %v533_v20 = vadd.f32 %v532_v4, %v467_v2  ;;  %v762_v4 = vsub.f32 %v760_v54, %v761_v60 }
 0x1f9   :  { %v575_v26 = vadd.f32 %v574_v7, %v533_v20  ;;  %v768_v7 = vsub.f32 %v731_v56, %v1369_v63 }
 0x1fa   :  { %v628_v21 = vpop.f32.mrf.mxu1 }
 0x1fb   :  { %v617_v31 = vadd.f32 %v616_v10, %v575_v26 }
 0x1fc   :  { %v584_v17 = vpop.f32.mrf.mxu0 }
 0x1fe   :  { %v483_v5 = vpop.f32.mrf.mxu2  ;;  %v536_v6 = vpop.f32.mrf.mxu3 }
 0x1ff   :  { %v537_v18 = vadd.f32 %v536_v6, %v475_v3  ;;  %v725_v3 = vld [vmem:[%s1407_s6 + $0x10] sm:$0xff] }
 0x201   :  { %v580_v23 = vadd.f32 %v579_v13, %v537_v18 }
 0x202   :  { %v634_v39 = vpop.f32.mrf.mxu1 }
 0x203   :  { %v623_v27 = vadd.f32 %v622_v14, %v580_v23 }
 0x204   :  { %v589_v30 = vpop.f32.mrf.mxu0 }
 0x206   :  { %v491_v8 = vpop.f32.mrf.mxu2  ;;  %v540_v9 = vpop.f32.mrf.mxu3 }
 0x207   :  { %v541_v19 = vadd.f32 %v540_v9, %v483_v5 }
 0x209   :  { %v585_v24 = vadd.f32 %v584_v17, %v541_v19  ;;  %v726_v19 = vld [vmem:[%s1407_s6 + $0x18] sm:$0xff] }
 0x20a   :  { %v737_v23 = vsel %vm130_vm0, %v726_v19, 0 }
 0x20b   :  { %v629_v28 = vadd.f32 %v628_v21, %v585_v24 }
 0x20e   :  { %v544_v11 = vpop.f32.mrf.mxu3  ;;  %v667_v12 = vpop.f32.mrf.mxu2 }
 0x20f   :  { %v545_v29 = vadd.f32 %v544_v11, %v491_v8  ;;  %v668_v35 = vadd.f32 %v667_v12, %v617_v31  ;;  %v734_v8 = vsel %vm130_vm0, %v725_v3, 0  ;;  %v763_v12 = vand.u32 4294901760, %v762_v4 }
 0x211   :  { %v590_v36 = vadd.f32 %v589_v30, %v545_v29 }
 0x213   :  { %v635_v43 = vadd.f32 %v634_v39, %v590_v36 }
 0x216   :  { %v671_v15 = vpop.f32.mrf.mxu2  ;;  %v704_v16 = vpop.f32.mrf.mxu3 }
 0x217   :  { %v672_v32 = vadd.f32 %v671_v15, %v623_v27  ;;  %v705_v40 = vadd.f32 %v704_v16, %v668_v35  ;;  %v769_v15 = vand.u32 4294901760, %v768_v7  ;;  %v775_v16 = vand.u32 4294901760, %v734_v8 }
 0x218   :  { %v783_v27 = vand.u32 4294901760, %v737_v23 }
 0x219   :  { %v770_v21 = vsub.f32 %v768_v7, %v769_v15 }
 0x21a   :  { %v784_v29 = vsub.f32 %v737_v23, %v783_v27 }
 0x21c   :  { %v785_v31 = vand.u32 4294901760, %v784_v29 }
 0x21e   :  { %v708_v22 = vpop.f32.mrf.mxu3  ;;  %v675_v25 = vpop.f32.mrf.mxu2 }
 0x21f   :  { %v676_v33 = vadd.f32 %v675_v25, %v629_v28  ;;  %v709_v37 = vadd.f32 %v708_v22, %v672_v32  ;;  %v776_v22 = vsub.f32 %v734_v8, %v775_v16  ;;  %v771_v25 = vand.u32 4294901760, %v770_v21 }
 0x220   :  { %v786_v32 = vsub.f32 %v784_v29, %v785_v31 }
 0x221   :  { %v777_v26 = vand.u32 4294901760, %v776_v22 }
 0x223   :  { %v778_v28 = vsub.f32 %v776_v22, %v777_v26 }
 0x225   :  { %v779_v30 = vand.u32 4294901760, %v778_v28 }
 0x226   :  { %v712_v34 = vpop.f32.mrf.mxu3  ;;  %v679_v42 = vpop.f32.mrf.mxu2 }
 0x227   :  { %v713_v38 = vadd.f32 %v712_v34, %v676_v33  ;;  %v680_v46 = vadd.f32 %v679_v42, %v635_v43  ;;  %v787_v33 = vand.u32 4294901760, %v786_v32 }
 0x229   :  { %1108 = vtanh.f32 %v713_v38 }
 0x22a   :  { %1110 = vtanh.f32 %v709_v37 }
 0x22b   :  { %1112 = vtanh.f32 %v705_v40 }
 0x22e   :  { %v716_v47 = vpop.f32.mrf.mxu3 }
 0x22f   :  { %v1109_v48 = vpop.eup %1108  ;;  %v717_v44 = vadd.f32 %v716_v47, %v680_v46 }
 0x230   :  { %v1111_v50 = vpop.eup %1110  ;;  %v1356_v51 = vand.u32 4294901760, %v1109_v48 }
 0x231   :  { %1114 = vtanh.f32 %v717_v44  ;;  %v1113_v53 = vpop.eup %1112  ;;  %v1362_v55 = vand.u32 4294901760, %v1111_v50 }
 0x232   :  { %v811_v57 = vsub.f32 %v1109_v48, %v1356_v51  ;;  %v1366_v58 = vand.u32 4294901760, %v1113_v53 }
 0x233   :  { %v817_v62 = vsub.f32 %v1111_v50, %v1362_v55 }
 0x234   :  { %v823_v1 = vsub.f32 %v1113_v53, %v1366_v58  ;;  %v812_v2 = vand.u32 4294901760, %v811_v57 }
 0x235   :  { %v818_v6 = vand.u32 4294901760, %v817_v62 }
 0x236   :  { %v813_v10 = vsub.f32 %v811_v57, %v812_v2  ;;  %v824_v11 = vand.u32 4294901760, %v823_v1 }
 0x237   :  { %v1115_v59 = vpop.eup %1114  ;;  %v819_v14 = vsub.f32 %v817_v62, %v818_v6 }
 0x238   :  { %v751_v61 = vand.u32 4294901760, %v1115_v59  ;;  %v814_v17 = vand.u32 4294901760, %v813_v10  ;;  %v825_v18 = vsub.f32 %v823_v1, %v824_v11 }
 0x239   :  { %v820_v20 = vand.u32 4294901760, %v819_v14 }
 0x23a   :  { %752 = vmatpush.msrb.mxu0 %v751_v61  ;;  %903 = vmatpush.msra.mxu3 %v751_v61  ;;  %v805_v0 = vsub.f32 %v1115_v59, %v751_v61  ;;  %v826_v24 = vand.u32 4294901760, %v825_v18 }
 0x23c   :  { %754 = vmatpush.msrb.mxu0 %v1356_v51  ;;  %859 = vmatpush.msra.mxu2 %v805_v0  ;;  %v806_v5 = vand.u32 4294901760, %v805_v0 }
 0x23d   :  { %905 = vmatpush.msra.mxu3 %v1356_v51 }
 0x23e   :  { %756 = vmatpush.msrb.mxu0 %v1362_v55  ;;  %862 = vmatpush.msra.mxu2 %v811_v57  ;;  %v807_v9 = vsub.f32 %v805_v0, %v806_v5 }
 0x23f   :  { %907 = vmatpush.msra.mxu3 %v1362_v55 }
 0x240   :  { %758 = vmatpush.msrb.mxu0 %v1366_v58  ;;  %865 = vmatpush.msra.mxu2 %v817_v62  ;;  %v808_v13 = vand.u32 4294901760, %v807_v9  ;;  %v1028_v9 = vpop.permute.xlu1 %1027 }
 0x241   :  { %909 = vmatpush.msra.mxu3 %v1366_v58  ;;  %764 = vmatmul.f32.vlgmr.msrb.gmra.mxu0 %v763_v12  ;;  %v1033_v12 = vpop.permute.xlu2 %1032 }
 0x242   :  { %950 = vmatpush.msra.mxu0 %v806_v5  ;;  %809 = vmatpush.msrb.mxu1 %v808_v13 }
 0x243   :  { %868 = vmatpush.msra.mxu2 %v823_v1  ;;  %913 = vmatmul.f32.vlgmr.msra.gmra.mxu3 %v761_v60 }
 0x244   :  { %954 = vmatpush.msra.mxu0 %v812_v2  ;;  %871 = vmatmul.f32.vlgmr.msra.gmra.mxu2 %v760_v54 }
 0x245   :  { %815 = vmatpush.msrb.mxu1 %v814_v17 }
 0x246   :  { %958 = vmatpush.msra.mxu0 %v818_v6 }
 0x247   :  { %821 = vmatpush.msrb.mxu1 %v820_v20 }
 0x248   :  { %962 = vmatpush.msra.mxu0 %v824_v11  ;;  %v1038_v20 = vpop.permute.xlu1 %1037 }
 0x249   :  { %827 = vmatpush.msrb.mxu1 %v826_v24  ;;  %772 = vmatmul.f32.gmra.mxu0 %v771_v25  ;;  %v1043_v25 = vpop.permute.xlu2 %1042 }
 0x24a   :  { %829 = vmatmul.f32.vlgmr.msrb.gmra.mxu1 %v1354_v49 }
 0x24b   :  { %993 = vmatpush.msra.mxu1 %v751_v61  ;;  %919 = vmatmul.f32.gmra.mxu3 %v769_v15 }
 0x24c   :  { %876 = vmatmul.f32.gmra.mxu2 %v768_v7 }
 0x24d   :  { %995 = vmatpush.msra.mxu1 %v1356_v51 }
 0x24f   :  { %997 = vmatpush.msra.mxu1 %v1362_v55 }
 0x251   :  { %999 = vmatpush.msra.mxu1 %v1366_v58  ;;  %780 = vmatmul.f32.gmra.mxu0 %v779_v30 }
 0x252   :  { %833 = vmatmul.f32.gmra.mxu1 %v1369_v63 }
 0x253   :  { %925 = vmatmul.f32.gmra.mxu3 %v777_v26 }
 0x254   :  { %881 = vmatmul.f32.gmra.mxu2 %v776_v22 }
 0x259   :  { %788 = vmatmul.f32.gmra.mxu0 %v787_v33  ;;  %v1062_v33 = vpop.permute.xlu0 %1061 }
 0x25a   :  { %837 = vmatmul.f32.gmra.mxu1 %v775_v16 }
 0x25b   :  { %931 = vmatmul.f32.gmra.mxu3 %v785_v31 }
 0x25c   :  { %886 = vmatmul.f32.gmra.mxu2 %v784_v29 }
 0x261   :  { %964 = vmatmul.f32.vlgmr.msra.gmra.mxu0 %v1354_v49 }
 0x262   :  { %841 = vmatmul.f32.gmra.mxu1 %v783_v27 }
 0x269   :  { %968 = vmatmul.f32.gmra.mxu0 %v1369_v63 }
 0x26a   :  { %1001 = vmatmul.f32.vlgmr.msra.gmra.mxu1 %v1354_v49 }
 0x271   :  { %972 = vmatmul.f32.gmra.mxu0 %v775_v16 }
 0x272   :  { %1005 = vmatmul.f32.gmra.mxu1 %v1369_v63 }
 0x279   :  { %976 = vmatmul.f32.gmra.mxu0 %v783_v27 }
 0x27a   :  { %1009 = vmatmul.f32.gmra.mxu1 %v775_v16 }
 0x282   :  { %1013 = vmatmul.f32.gmra.mxu1 %v783_v27 }
 0x2be   :  { %v765_v34 = vpop.f32.mrf.mxu0 }
 0x2c6   :  { %v773_v36 = vpop.f32.mrf.mxu0  ;;  %v914_v42 = vpop.f32.mrf.mxu3 }
 0x2c7   :  { %v830_v35 = vpop.f32.mrf.mxu1  ;;  %v872_v40 = vpop.f32.mrf.mxu2 }
 0x2c8   :  { %v831_v50 = vadd.f32 %v830_v35, %v765_v34  ;;  %v1064_v35 = vperm.slane %v1062_v33, 0 }
 0x2ca   :  { %v873_v54 = vadd.f32 %v872_v40, %v831_v50 }
 0x2cc   :  { %v915_v60 = vadd.f32 %v914_v42, %v873_v54 }
 0x2ce   :  { %v781_v38 = vpop.f32.mrf.mxu0  ;;  %v920_v47 = vpop.f32.mrf.mxu3 }
 0x2cf   :  { %v834_v37 = vpop.f32.mrf.mxu1  ;;  %v877_v45 = vpop.f32.mrf.mxu2 }
 0x2d0   :  { %v835_v44 = vadd.f32 %v834_v37, %v773_v36 }
 0x2d2   :  { %v878_v53 = vadd.f32 %v877_v45, %v835_v44 }
 0x2d4   :  { %v921_v58 = vadd.f32 %v920_v47, %v878_v53 }
 0x2d6   :  { %v789_v41 = vpop.f32.mrf.mxu0  ;;  %v926_v56 = vpop.f32.mrf.mxu3 }
 0x2d7   :  { %v838_v39 = vpop.f32.mrf.mxu1  ;;  %v882_v51 = vpop.f32.mrf.mxu2 }
 0x2d8   :  { %v839_v52 = vadd.f32 %v838_v39, %v781_v38 }
 0x2da   :  { %v883_v57 = vadd.f32 %v882_v51, %v839_v52 }
 0x2dc   :  { %v927_v63 = vadd.f32 %v926_v56, %v883_v57 }
 0x2de   :  { %v965_v46 = vpop.f32.mrf.mxu0  ;;  %v932_v8 = vpop.f32.mrf.mxu3 }
 0x2df   :  { %v842_v43 = vpop.f32.mrf.mxu1  ;;  %v966_v0 = vadd.f32 %v965_v46, %v915_v60  ;;  %v887_v1 = vpop.f32.mrf.mxu2 }
 0x2e0   :  { %v843_v61 = vadd.f32 %v842_v43, %v789_v41 }
 0x2e2   :  { %v888_v7 = vadd.f32 %v887_v1, %v843_v61 }
 0x2e4   :  { %v933_v11 = vadd.f32 %v932_v8, %v888_v7 }
 0x2e6   :  { %v969_v49 = vpop.f32.mrf.mxu0 }
 0x2e7   :  { %v1002_v48 = vpop.f32.mrf.mxu1  ;;  %v970_v62 = vadd.f32 %v969_v49, %v921_v58 }
 0x2e8   :  { %v1003_v4 = vadd.f32 %v1002_v48, %v966_v0 }
 0x2ee   :  { %v973_v59 = vpop.f32.mrf.mxu0 }
 0x2ef   :  { %v1006_v55 = vpop.f32.mrf.mxu1  ;;  %v974_v3 = vadd.f32 %v973_v59, %v927_v63 }
 0x2f0   :  { %v1007_v2 = vadd.f32 %v1006_v55, %v970_v62 }
 0x2f2   :  { %1116 = vtanh.f32 %v1007_v2 }
 0x2f3   :  { %1118 = vtanh.f32 %v1003_v4 }
 0x2f6   :  { %v977_v10 = vpop.f32.mrf.mxu0 }
 0x2f7   :  { %v1010_v5 = vpop.f32.mrf.mxu1  ;;  %v978_v13 = vadd.f32 %v977_v10, %v933_v11 }
 0x2f8   :  { %v1011_v6 = vadd.f32 %v1010_v5, %v974_v3  ;;  %v1117_v15 = vpop.eup %1116 }
 0x2f9   :  { %v1119_v17 = vpop.eup %1118  ;;  %v1046_v19 = vmul.f32 %v1117_v15, %v1033_v12 }
 0x2fa   :  { %1120 = vtanh.f32 %v1011_v6  ;;  %v1045_v21 = vmul.f32 %v1119_v17, %v1028_v9 }
 0x2fc   :  { %v1049_v23 = vadd.f32 %v1046_v19, %v1045_v21 }
 0x2ff   :  { %v1014_v14 = vpop.f32.mrf.mxu1 }
 0x300   :  { %v1015_v16 = vadd.f32 %v1014_v14, %v978_v13  ;;  %v1121_v18 = vpop.eup %1120 }
 0x301   :  { %v1047_v22 = vmul.f32 %v1121_v18, %v1038_v20 }
 0x302   :  { %1122 = vtanh.f32 %v1015_v16 }
 0x303   :  { %v1050_v26 = vadd.f32 %v1049_v23, %v1047_v22 }
 0x308   :  { %v1123_v24 = vpop.eup %1122 }
 0x309   :  { %v1048_v27 = vmul.f32 %v1123_v24, %v1043_v25 }
 0x30b   :  { %v1051_v28 = vadd.f32 %v1050_v26, %v1048_v27 }
 0x30d   :  { %v1052_v29 = vrot.slane %v1051_v28, 4 }
 0x30f   :  { %v1053_v30 = vadd.f32 %v1052_v29, %v1051_v28 }
 0x311   :  { %v1054_v31 = vrot.slane %v1053_v30, 2 }
 0x313   :  { %v1055_v32 = vadd.f32 %v1054_v31, %v1053_v30 }
 0x315   :  { %v1056_v34 = vrot.slane %v1055_v32, 1 }
 0x317   :  { %v1057_v36 = vadd.f32 %v1056_v34, %v1055_v32 }
 0x319   :  { %v1065_v37 = vadd.f32 %v1064_v35, %v1057_v36 }
 0x31b   :  { %1066 = vst [vmem:[%s1408_s9] sm:$0x1] %v1065_v37 }

</bundles_post_ra>
